<compile_context>
chip_gen: v7x
topology: tpu7x:2x2x1
jax: 0.10.0
libtpu: 0.0.40
codegen_flags: <defaults>
</compile_context>

<pallas_src>
import functools
from typing import NamedTuple

import jax
import jax.numpy as jnp
from jax.experimental import pallas as pl
from jax.experimental.pallas import tpu as pltpu


def _round_up(n: int, m: int) -> int:
    return ((n + m - 1) // m) * m


# ---------------------------------------------------------------------------
# Kernel body
# ---------------------------------------------------------------------------
def resblock_kernel(x_ref, w1_ref, b1_ref, w2_ref, b2_ref, o_ref):
    # x_ref: (tb, Hp) compute-dtype tile; weights pre-transposed to [H_in, H_out].
    x = x_ref[...]
    # lin1 on the MXU with f32 accumulation; bias + relu in f32 (VPU epilogue).
    h = jnp.dot(x, w1_ref[...], preferred_element_type=jnp.float32)
    h = jnp.maximum(h + b1_ref[...], 0.0)
    # TODO(synk): optionally split lin1's output columns into 2-4 static chunks
    # so the bias+ReLU+cast epilogue of chunk n overlaps the MXU push of chunk
    # n+1 (keep only if a bundle dump shows vmatmul spacing tighten).
    # lin2 (cast activations back to the MXU-native compute dtype).
    y = jnp.dot(h.astype(w2_ref.dtype), w2_ref[...],
                preferred_element_type=jnp.float32)
    # bias + residual add + relu, all in f32.
    y = y + b2_ref[...] + x.astype(jnp.float32)
    o_ref[...] = jnp.maximum(y, 0.0).astype(o_ref.dtype)


# ---------------------------------------------------------------------------
# One-time, cached hardware / feature probes
# ---------------------------------------------------------------------------
@functools.lru_cache(maxsize=None)
def _vmem_budget_bytes() -> int:
    """~85% of the chip's physical VMEM (headroom for the compiler)."""
    try:
        cap = int(pltpu.get_tpu_info().vmem_capacity_bytes)
    except Exception:
        cap = 64 * 1024 * 1024  # conservative (v7x per-TC size)
    return int(cap * 0.85)


@functools.lru_cache(maxsize=None)
def _single_buffer_weights_supported() -> bool:
    """One-time probe: does this Pallas build accept pl.Buffered(1) BlockSpecs?"""
    try:
        def probe_kernel(x_ref, w_ref, o_ref):
            o_ref[...] = x_ref[...] + w_ref[...]

        call = pl.pallas_call(
            probe_kernel,
            out_shape=jax.ShapeDtypeStruct((8, 128), jnp.float32),
            grid_spec=pltpu.PrefetchScalarGridSpec(
                num_scalar_prefetch=0,
                grid=(1,),
                in_specs=[
                    pl.BlockSpec((8, 128), lambda i: (0, 0)),
                    pl.BlockSpec((8, 128), lambda i: (0, 0),
                                 pipeline_mode=pl.Buffered(1)),
                ],
                out_specs=pl.BlockSpec((8, 128), lambda i: (0, 0)),
            ),
        )
        z = jnp.zeros((8, 128), jnp.float32)
        jax.jit(call).lower(z, z).compile()  # AOT compile only, never executed
        return True
    except Exception:
        return False


# ---------------------------------------------------------------------------
# VMEM accounting & tile selection
# ---------------------------------------------------------------------------
def _weight_bytes(Hp: int, cb: int, n_weight_bufs: int) -> int:
    # two [Hp, Hp] weights + two (1, Hp) f32 biases (8-sublane padded in VMEM)
    return n_weight_bufs * (2 * Hp * Hp * cb + 2 * 8 * Hp * 4)


def _tile_bytes(tb: int, Hp: int, cb: int, ob: int) -> int:
    # double-buffered x/out tiles + in-kernel intermediates (f32 h, bf16 h, f32 y)
    return 2 * tb * Hp * (cb + ob) + 10 * tb * Hp


def _choose_batch_tile(B: int, Hp: int, cb: int, ob: int,
                       n_weight_bufs: int, budget: int) -> int:
    wbytes = _weight_bytes(Hp, cb, n_weight_bufs)
    headroom = 2 << 20
    chosen = None
    for tb in (512, 384, 256, 192, 128, 96, 64, 48, 32, 16):
        if wbytes + _tile_bytes(tb, Hp, cb, ob) + headroom <= budget:
            chosen = tb
            break
    if chosen is None:
        # TODO(synk): K-tiled reduction-grid path for very large hidden sizes.
        raise NotImplementedError(
            f"ResBlock hidden size Hp={Hp} needs K-tiled weights: resident "
            f"weights do not fit the VMEM budget ({budget} bytes).")
    # Don't tile beyond the (padded) batch.
    tb = min(chosen, max(16, _round_up(B, 16)))
    # Megacore (v7x has 2 TensorCores): prefer >= 2 parallel grid steps when the
    # batch allows, so dimension_semantics=("parallel",) can shard the tiles.
    if B > 16 and (_round_up(B, tb) // tb) < 2:
        tb = max(16, _round_up((B + 1) // 2, 16))
    return tb


# ---------------------------------------------------------------------------
# Cached pallas_call / jitted apply builders
# ---------------------------------------------------------------------------
@functools.lru_cache(maxsize=None)
def _build_resblock_call(Bp, Hp, tb, cd_name, od_name, single_buffer,
                         vmem_limit):
    cd = jnp.dtype(cd_name)
    od = jnp.dtype(od_name)
    cb, ob = cd.itemsize, od.itemsize

    # Weights / biases have a constant index_map; single VMEM buffer suffices.
    wkw = {"pipeline_mode": pl.Buffered(1)} if single_buffer else {}

    grid_spec = pltpu.PrefetchScalarGridSpec(
        num_scalar_prefetch=0,
        grid=(Bp // tb,),
        in_specs=[
            pl.BlockSpec((tb, Hp), lambda i: (i, 0)),           # x tile
            pl.BlockSpec((Hp, Hp), lambda i: (0, 0), **wkw),    # W1^T (resident)
            pl.BlockSpec((1, Hp), lambda i: (0, 0), **wkw),     # b1 (f32)
            pl.BlockSpec((Hp, Hp), lambda i: (0, 0), **wkw),    # W2^T (resident)
            pl.BlockSpec((1, Hp), lambda i: (0, 0), **wkw),     # b2 (f32)
        ],
        out_specs=pl.BlockSpec((tb, Hp), lambda i: (i, 0)),
    )

    cost = pl.CostEstimate(
        flops=4 * Bp * Hp * Hp,              # two [Bp,Hp] x [Hp,Hp] matmuls
        transcendentals=0,
        bytes_accessed=(Bp * Hp * cb         # x
                        + 2 * Hp * Hp * cb   # W1^T, W2^T
                        + 2 * Hp * 4         # biases (f32)
                        + Bp * Hp * ob),     # out
    )

    return pl.pallas_call(
        resblock_kernel,
        out_shape=jax.ShapeDtypeStruct((Bp, Hp), od),
        grid_spec=grid_spec,
        cost_estimate=cost,
        compiler_params=pltpu.CompilerParams(
            dimension_semantics=("parallel",),
            vmem_limit_bytes=int(vmem_limit),
        ),
    )


@functools.lru_cache(maxsize=None)
def _build_apply(B, H, Bp, Hp, tb, cd_name, od_name, single_buffer,
                 vmem_limit):
    """jit(pad-x -> pallas_call -> slice) for one (shape, dtype) configuration."""
    call = _build_resblock_call(Bp, Hp, tb, cd_name, od_name, single_buffer,
                                vmem_limit)
    cd = jnp.dtype(cd_name)

    def apply(x, w1t, b1, w2t, b2):
        if B == Bp and H == Hp:
            xp = x.astype(cd)
        else:
            xp = jnp.zeros((Bp, Hp), cd).at[:B, :H].set(x.astype(cd))
        out_p = call(xp, w1t, b1, w2t, b2)
        return out_p[:B, :H]

    return jax.jit(apply)


# ---------------------------------------------------------------------------
# Public API
# ---------------------------------------------------------------------------
class ResBlockParams(NamedTuple):
    w1t: jax.Array   # (Hp, Hp) compute dtype, transposed, zero-padded
    b1: jax.Array    # (1, Hp) f32, zero-padded
    w2t: jax.Array   # (Hp, Hp)
    b2: jax.Array    # (1, Hp)
    num_hidden: int  # original H


def prepare_resblock_params(w1, b1, w2, b2, *, compute_dtype=jnp.bfloat16):
    """One-time weight prep (transpose + cast + zero-pad). Hoist out of hot loop.

    w1, w2: [H, H] in PyTorch nn.Linear layout (out_features, in_features);
    b1, b2: [H]. Zero padding is exact for this block: padded weight rows/cols
    and bias lanes are zero, so padded output columns stay zero.
    """
    H = w1.shape[0]
    Hp = _round_up(H, 128)
    cd = compute_dtype
    w1t = jnp.zeros((Hp, Hp), cd).at[:H, :H].set(w1.T.astype(cd))
    w2t = jnp.zeros((Hp, Hp), cd).at[:H, :H].set(w2.T.astype(cd))
    b1p = jnp.zeros((1, Hp), jnp.float32).at[0, :H].set(b1.astype(jnp.float32))
    b2p = jnp.zeros((1, Hp), jnp.float32).at[0, :H].set(b2.astype(jnp.float32))
    return ResBlockParams(w1t, b1p, w2t, b2p, H)


def resblock_apply(x, params: ResBlockParams, *, out_dtype=None):
    """ResBlock forward with pre-prepared params. x: [B, H]."""
    B, H = x.shape
    assert H == params.num_hidden, (H, params.num_hidden)
    Hp = params.w1t.shape[0]
    cd = jnp.dtype(params.w1t.dtype)
    od = jnp.dtype(out_dtype if out_dtype is not None else x.dtype)

    single = _single_buffer_weights_supported()
    budget = _vmem_budget_bytes()
    n_weight_bufs = 1 if single else 2

    tb = _choose_batch_tile(B, Hp, cd.itemsize, od.itemsize, n_weight_bufs,
                            budget)
    Bp = _round_up(B, tb)

    apply = _build_apply(B, H, Bp, Hp, tb, cd.name, od.name, single, budget)
    return apply(x, params.w1t, params.b1, params.w2t, params.b2)


def resblock_forward(x, w1, b1, w2, b2, *, compute_dtype=jnp.bfloat16):
    """Convenience wrapper (re-preps weights every call; in a real training /
    inference loop call prepare_resblock_params once and reuse resblock_apply)."""
    params = prepare_resblock_params(w1, b1, w2, b2, compute_dtype=compute_dtype)
    return resblock_apply(x, params)


def resblock_ref(x, w1, b1, w2, b2):
    h = jnp.maximum(x @ w1.T + b1, 0.0)
    y = h @ w2.T + b2
    return jnp.maximum(y + x, 0.0)


if __name__ == "__main__":
    B, H = 16, 32  # batch, num_hidden (small demo shapes)

    key = jax.random.PRNGKey(0)
    kx, kw1, kb1, kw2, kb2 = jax.random.split(key, 5)

    # Deterministic PyTorch-like init: uniform(-1/sqrt(H), 1/sqrt(H)).
    bound = 1.0 / jnp.sqrt(jnp.float32(H))
    x = jax.random.normal(kx, (B, H), dtype=jnp.float32)
    w1 = jax.random.uniform(kw1, (H, H), jnp.float32, -bound, bound)
    b1 = jax.random.uniform(kb1, (H,), jnp.float32, -bound, bound)
    w2 = jax.random.uniform(kw2, (H, H), jnp.float32, -bound, bound)
    b2 = jax.random.uniform(kb2, (H,), jnp.float32, -bound, bound)

    # Weight prep hoisted out of the hot path.
    params = prepare_resblock_params(w1, b1, w2, b2)
    out = jax.block_until_ready(resblock_apply(x, params))

    ref = resblock_ref(x, w1, b1, w2, b2)
    assert out.shape == (B, H)
    # bf16 matmul operands (incl. the residual copy of x and the rounded hidden
    # activation) with f32 accumulation -> relaxed tolerance vs f32 reference.
    assert jnp.allclose(out, ref, atol=5e-2, rtol=5e-2), (
        float(jnp.max(jnp.abs(out - ref))))

    print("KERNEL_OK")
</pallas_src>

<mosaic_0001>
module attributes {stable_mosaic.version = 11 : i64} {
  func.func @resblock_kernel(%arg0: i32, %arg1: memref<16x128xbf16, #tpu.memory_space<vmem>>, %arg2: memref<128x128xbf16, #tpu.memory_space<vmem>>, %arg3: memref<1x128xf32, #tpu.memory_space<vmem>>, %arg4: memref<128x128xbf16, #tpu.memory_space<vmem>>, %arg5: memref<1x128xf32, #tpu.memory_space<vmem>>, %arg6: memref<16x128xf32, #tpu.memory_space<vmem>>) attributes {dimension_semantics = [#tpu.dimension_semantics<parallel>], iteration_bounds = array<i64: 1>, scalar_prefetch = 0 : i64, scratch_operands = 0 : i64, tpu.core_type = #tpu.core_type<tc>, window_params = [{transform_indices = @transform_0, window_bounds = array<i64: 16, 128>}, {pipeline_mode = #tpu.pipeline_mode<synchronous>, transform_indices = @transform_1, window_bounds = array<i64: 128, 128>}, {pipeline_mode = #tpu.pipeline_mode<synchronous>, transform_indices = @transform_2, window_bounds = array<i64: 1, 128>}, {pipeline_mode = #tpu.pipeline_mode<synchronous>, transform_indices = @transform_3, window_bounds = array<i64: 128, 128>}, {pipeline_mode = #tpu.pipeline_mode<synchronous>, transform_indices = @transform_4, window_bounds = array<i64: 1, 128>}, {transform_indices = @transform_5, window_bounds = array<i64: 16, 128>}]} {
    %c0 = arith.constant 0 : index
    %c0_0 = arith.constant 0 : index
    %0 = vector.load %arg1[%c0, %c0_0] : memref<16x128xbf16, #tpu.memory_space<vmem>>, vector<16x128xbf16>
    %c0_1 = arith.constant 0 : index
    %c0_2 = arith.constant 0 : index
    %1 = vector.load %arg2[%c0_1, %c0_2] : memref<128x128xbf16, #tpu.memory_space<vmem>>, vector<128x128xbf16>
    %cst = arith.constant dense<0.000000e+00> : vector<16x128xf32>
    %2 = tpu.matmul %0, %1, %cst {dimension_numbers = #tpu.dot_dimension_numbers<[1], [0], [0], [1], [0, 0, 1, 1], [], []>} : vector<16x128xbf16>, vector<128x128xbf16>, vector<16x128xf32> -> vector<16x128xf32>
    %c0_3 = arith.constant 0 : index
    %c0_4 = arith.constant 0 : index
    %3 = vector.load %arg3[%c0_3, %c0_4] : memref<1x128xf32, #tpu.memory_space<vmem>>, vector<1x128xf32>
    %4 = vector.broadcast %3 : vector<1x128xf32> to vector<16x128xf32>
    %5 = arith.addf %2, %4 : vector<16x128xf32>
    %cst_5 = arith.constant 0.000000e+00 : f32
    %6 = vector.broadcast %cst_5 : f32 to vector<16x128xf32>
    %7 = arith.maximumf %5, %6 : vector<16x128xf32>
    %8 = arith.truncf %7 : vector<16x128xf32> to vector<16x128xbf16>
    %c0_6 = arith.constant 0 : index
    %c0_7 = arith.constant 0 : index
    %9 = vector.load %arg4[%c0_6, %c0_7] : memref<128x128xbf16, #tpu.memory_space<vmem>>, vector<128x128xbf16>
    %cst_8 = arith.constant dense<0.000000e+00> : vector<16x128xf32>
    %10 = tpu.matmul %8, %9, %cst_8 {dimension_numbers = #tpu.dot_dimension_numbers<[1], [0], [0], [1], [0, 0, 1, 1], [], []>} : vector<16x128xbf16>, vector<128x128xbf16>, vector<16x128xf32> -> vector<16x128xf32>
    %c0_9 = arith.constant 0 : index
    %c0_10 = arith.constant 0 : index
    %11 = vector.load %arg5[%c0_9, %c0_10] : memref<1x128xf32, #tpu.memory_space<vmem>>, vector<1x128xf32>
    %12 = vector.broadcast %11 : vector<1x128xf32> to vector<16x128xf32>
    %13 = arith.addf %10, %12 : vector<16x128xf32>
    %14 = arith.extf %0 : vector<16x128xbf16> to vector<16x128xf32>
    %15 = arith.addf %13, %14 : vector<16x128xf32>
    %cst_11 = arith.constant 0.000000e+00 : f32
    %16 = vector.broadcast %cst_11 : f32 to vector<16x128xf32>
    %17 = arith.maximumf %15, %16 : vector<16x128xf32>
    %c0_12 = arith.constant 0 : index
    %c0_13 = arith.constant 0 : index
    %18 = vector.load %arg6[%c0_12, %c0_13] : memref<16x128xf32, #tpu.memory_space<vmem>>, vector<16x128xf32>
    tpu.vector_store %arg6[%c0_12, %c0_13], %17 {strides = array<i32>} : memref<16x128xf32, #tpu.memory_space<vmem>>, vector<16x128xf32>,
    return
  }
  func.func @transform_0(%arg0: i32) -> (i32, i32) {
    %c0_i32 = arith.constant 0 : i32
    %c0_i32_0 = arith.constant 0 : i32
    return %arg0, %c0_i32 : i32, i32
  }
  func.func @transform_1(%arg0: i32) -> (i32, i32) {
    %c0_i32 = arith.constant 0 : i32
    %c0_i32_0 = arith.constant 0 : i32
    %c0_i32_1 = arith.constant 0 : i32
    return %c0_i32, %c0_i32_0 : i32, i32
  }
  func.func @transform_2(%arg0: i32) -> (i32, i32) {
    %c0_i32 = arith.constant 0 : i32
    %c0_i32_0 = arith.constant 0 : i32
    %c0_i32_1 = arith.constant 0 : i32
    return %c0_i32, %c0_i32_0 : i32, i32
  }
  func.func @transform_3(%arg0: i32) -> (i32, i32) {
    %c0_i32 = arith.constant 0 : i32
    %c0_i32_0 = arith.constant 0 : i32
    %c0_i32_1 = arith.constant 0 : i32
    return %c0_i32, %c0_i32_0 : i32, i32
  }
  func.func @transform_4(%arg0: i32) -> (i32, i32) {
    %c0_i32 = arith.constant 0 : i32
    %c0_i32_0 = arith.constant 0 : i32
    %c0_i32_1 = arith.constant 0 : i32
    return %c0_i32, %c0_i32_0 : i32, i32
  }
  func.func @transform_5(%arg0: i32) -> (i32, i32) {
    %c0_i32 = arith.constant 0 : i32
    %c0_i32_0 = arith.constant 0 : i32
    return %arg0, %c0_i32 : i32, i32
  }
}

</mosaic_0001>

<bundles_post_ra>
// kernel: apply.1
= control target key start
LH: loop header
LB: loop body
LE: loop exit
PB: predicated region body
PF: predicated region fallthrough
CT: control target
= control target key end

     0   :  { %10 = vsyncpa [#allocation3], 0  ;;  %s571_s0 = inlined_call_operand.vmem [shape: bf16[16,128], index: 0, kind: input, shape index: {}]   ;;  %s572_s1 = inlined_call_operand.hbm [shape: bf16[128,128], index: 1, kind: input, shape index: {}]   ;;  %s573_s2 = inlined_call_operand.vmem [shape: f32[1,128], index: 2, kind: input, shape index: {}]   ;;  %s574_s3 = inlined_call_operand.hbm [shape: bf16[128,128], index: 3, kind: input, shape index: {}]   ;;  %s575_s4 = inlined_call_operand.vmem [shape: f32[1,128], index: 4, kind: input, shape index: {}]   ;;  %s576_s5 = inlined_call_operand.hbm [shape: f32[16,128], index: 5, kind: output, shape index: {}]  }
   0x1   :  { %11 = vsyncpa [#allocation6], 0 }
   0x2   :  { %12 = vsyncpa [#allocation4], 0  ;;  %s487_s18 = smov [#allocation2]   ;;  %s415_s22 = scalar_lea.hbm %s572_s1, 1024 }
   0x3   :  { %s20_s19 = sshll.u32 %s487_s18, 4  ;;  %p416_p0 = scmp.ne.s32.totalorder %s572_s1, %s415_s22  ;;  %s21_s19 = int_to_ptr.vmem [resolvable:$true] %s20_s19 }
   0x4   :  { %p419_p1 = scmp.lt.u32.totalorder %s415_s22, %s572_s1 }
   0x6   :  { %p421_p2 = pnand %p419_p1, %p416_p0 }
   0x8   :  { %424 = shalt.err (!%p421_p2)
}
   0x9   :  { %s425_s27 = scalar_lea.vmem %s21_s19, 1024  ;;  %p430_p4 = scmp.lt.s32.totalorder %s21_s19, %s21_s19 }
   0xa   :  { %p426_p3 = scmp.ne.s32.totalorder %s21_s19, %s425_s27  ;;  %p431_p5 = scmp.lt.s32.totalorder %s425_s27, %s425_s27 }
   0xc   :  { %p432_p6 = por %p431_p5, %p430_p4 }
   0xe   :  { %p433_p7 = pnand %p432_p6, %p426_p3 }
  0x10   :  { %436 = shalt.err (!%p433_p7)
}
  0x11   :  { %s488_s28 = smov 64   ;;  %s489_s29 = smov 4  }
  0x12   :  { %26 = dma.hbm_to_vmem [thread:$0]  %s572_s1, 1024, %s21_s19, [#allocation3], %s488_s28, %s488_s28, %s489_s29  }
  0x13   :  { %s490_s7 = smov [#allocation5]   ;;  %s437_s11 = scalar_lea.hbm %s574_s3, 1024 }
  0x14   :  { %s34_s8 = sshll.u32 %s490_s7, 4  ;;  %p438_p8 = scmp.ne.s32.totalorder %s574_s3, %s437_s11  ;;  %s35_s8 = int_to_ptr.vmem [resolvable:$true] %s34_s8 }
  0x15   :  { %p441_p9 = scmp.lt.u32.totalorder %s437_s11, %s574_s3 }
  0x17   :  { %p443_p10 = pnand %p441_p9, %p438_p8 }
  0x19   :  { %446 = shalt.err (!%p443_p10)
}
  0x1a   :  { %s447_s16 = scalar_lea.vmem %s35_s8, 1024  ;;  %p452_p12 = scmp.lt.s32.totalorder %s35_s8, %s35_s8 }
  0x1b   :  { %p448_p11 = scmp.ne.s32.totalorder %s35_s8, %s447_s16  ;;  %p453_p13 = scmp.lt.s32.totalorder %s447_s16, %s447_s16 }
  0x1d   :  { %p454_p0 = por %p453_p13, %p452_p12 }
  0x1f   :  { %p455_p1 = pnand %p454_p0, %p448_p11 }
  0x21   :  { %458 = shalt.err (!%p455_p1)
}
  0x22   :  { %40 = dma.hbm_to_vmem [thread:$0]  %s574_s3, 1024, %s35_s8, [#allocation6], %s488_s28, %s488_s28, %s489_s29  }
  0x23   :  { %481 = dma.done.wait [#allocation3], 1024  }
  0x24   :  { %482 = vsyncadd [#allocation3], 4294966272 }
  0x25   :  { %483 = dma.done.wait [#allocation6], 1024  }
  0x26   :  { %484 = vsyncadd [#allocation6], 4294966272  ;;  %v491_v0 = vmov 0.0   ;;  %vm492_vm0 = vmmov 0   ;;  %v397_v1 = vld [vmem:[#allocation2] sm:$0xff]   ;;  %v398_v2 = vld [vmem:[#allocation2 + $0x8] sm:$0xff]  }
  0x27   :  { %348 = vmatprep.subr.bf16.mxu0 %v491_v0  ;;  %364 = vmatprep.mubr.msk.bf16.mxu0 %vm492_vm0, %v491_v0  ;;  %v399_v3 = vld [vmem:[#allocation2 + $0x10] sm:$0xff]   ;;  %v406_v4 = vld [vmem:[#allocation5] sm:$0xff]   ;;  %v400_v5 = vld [vmem:[#allocation2 + $0x18] sm:$0xff]  }
  0x28   :  { %368 = vmatprep.subr.bf16.mxu1 %v491_v0  ;;  %384 = vmatprep.mubr.msk.bf16.mxu1 %vm492_vm0, %v491_v0  ;;  %v407_v6 = vld [vmem:[#allocation5 + $0x8] sm:$0xff]   ;;  %v401_v7 = vld [vmem:[#allocation2 + $0x20] sm:$0xff]   ;;  %v408_v8 = vld [vmem:[#allocation5 + $0x10] sm:$0xff]  }
  0x29   :  { %349 = vmatpush3.bf16.msra.mxu0 %v397_v1  ;;  %369 = vmatpush3.bf16.msra.mxu1 %v406_v4  ;;  %v402_v9 = vld [vmem:[#allocation2 + $0x28] sm:$0xff]   ;;  %v409_v10 = vld [vmem:[#allocation5 + $0x18] sm:$0xff]   ;;  %v403_v11 = vld [vmem:[#allocation2 + $0x30] sm:$0xff]  }
  0x2a   :  { %350 = vmatprep.subr.bf16.mxu0 %v491_v0  ;;  %370 = vmatprep.subr.bf16.mxu1 %v491_v0  ;;  %v410_v12 = vld [vmem:[#allocation5 + $0x20] sm:$0xff]   ;;  %v404_v13 = vld [vmem:[#allocation2 + $0x38] sm:$0xff]   ;;  %v411_v15 = vld [vmem:[#allocation5 + $0x28] sm:$0xff]  }
  0x2b   :  { %v50_v14 = vld [vmem:[%s571_s0] sm:$0xff]   ;;  %v412_v16 = vld [vmem:[#allocation5 + $0x30] sm:$0xff]   ;;  %v413_v17 = vld [vmem:[#allocation5 + $0x38] sm:$0xff]  }
  0x2c   :  { %v311_v18 = vld [vmem:[%s573_s2] ss:$0 sm:$0xff]  ;;  %v285_v29 = vunpack.c.l.bf16 %v50_v14  ;;  %v286_v33 = vunpack.c.h.bf16 %v50_v14  ;;  %s493_s2 = smov [#allocation7]  }
  0x2d   :  { %351 = vmatpush3.bf16.msra.mxu0 %v398_v2  ;;  %371 = vmatpush3.bf16.msra.mxu1 %v407_v6  ;;  %v321_v28 = vld [vmem:[%s575_s4] ss:$0 sm:$0xff]  ;;  %s298_s22 = sshll.u32 %s493_s2, 4  ;;  %s299_s22 = int_to_ptr.vmem [resolvable:$true] %s298_s22 }
  0x2e   :  { %352 = vmatprep.subr.bf16.mxu0 %v491_v0  ;;  %372 = vmatprep.subr.bf16.mxu1 %v491_v0  ;;  %s459_s23 = scalar_lea.vmem %s299_s22, 256  ;;  %p464_p3 = scmp.lt.s32.totalorder %s299_s22, %s299_s22 }
  0x2f   :  { %p460_p2 = scmp.ne.s32.totalorder %s299_s22, %s459_s23  ;;  %p465_p4 = scmp.lt.s32.totalorder %s459_s23, %s459_s23 }
  0x31   :  { %353 = vmatpush3.bf16.msra.mxu0 %v399_v3  ;;  %373 = vmatpush3.bf16.msra.mxu1 %v408_v8  ;;  %p466_p5 = por %p465_p4, %p464_p3 }
  0x32   :  { %354 = vmatprep.subr.bf16.mxu0 %v491_v0  ;;  %374 = vmatprep.subr.bf16.mxu1 %v491_v0 }
  0x33   :  { %p467_p6 = pnand %p466_p5, %p460_p2 }
  0x35   :  { %355 = vmatpush3.bf16.msra.mxu0 %v400_v5  ;;  %375 = vmatpush3.bf16.msra.mxu1 %v409_v10 }
  0x36   :  { %356 = vmatprep.subr.bf16.mxu0 %v491_v0  ;;  %376 = vmatprep.subr.bf16.mxu1 %v491_v0 }
  0x39   :  { %357 = vmatpush3.bf16.msra.mxu0 %v401_v7  ;;  %377 = vmatpush3.bf16.msra.mxu1 %v410_v12 }
  0x3a   :  { %358 = vmatprep.subr.bf16.mxu0 %v491_v0  ;;  %378 = vmatprep.subr.bf16.mxu1 %v491_v0 }
  0x3d   :  { %359 = vmatpush3.bf16.msra.mxu0 %v402_v9  ;;  %379 = vmatpush3.bf16.msra.mxu1 %v411_v15 }
  0x3e   :  { %360 = vmatprep.subr.bf16.mxu0 %v491_v0  ;;  %380 = vmatprep.subr.bf16.mxu1 %v491_v0 }
  0x41   :  { %361 = vmatpush3.bf16.msra.mxu0 %v403_v11  ;;  %381 = vmatpush3.bf16.msra.mxu1 %v412_v16 }
  0x42   :  { %362 = vmatprep.subr.bf16.mxu0 %v491_v0  ;;  %382 = vmatprep.subr.bf16.mxu1 %v491_v0 }
  0x45   :  { %363 = vmatpush3.bf16.msra.mxu0 %v404_v13  ;;  %383 = vmatpush3.bf16.msra.mxu1 %v413_v17 }
  0x48   :  { %365 = vmatmul.mubr.bf16.vlgmr.msra.gmra.mrb[0].mxu0 %v50_v14 }
 0x11b   :  { %v163_v19 = vpop.f32.mrb[0].mxu0 }
 0x11c   :  { %v164_v20 = vadd.f32 %v311_v18, %v163_v19  ;;  %v366_v21 = vpop.f32.mrb[1].mxu0 }
 0x11d   :  { %v166_v22 = vpop.f32.mrb[2].mxu0 }
 0x11e   :  { %v167_v23 = vadd.f32 %v311_v18, %v166_v22  ;;  %v367_v24 = vpop.f32.mrb[3].mxu0  ;;  %v170_v25 = vmax.f32 %v164_v20, 0.0 }
 0x120   :  { %v171_v26 = vmax.f32 %v167_v23, 0.0 }
 0x122   :  { %v172_v27 = vpack.c.bf16 %v171_v26, %v170_v25 }
 0x124   :  { %385 = vmatmul.mubr.bf16.vlgmr.msra.gmra.mrb[0].mxu1 %v172_v27 }
 0x1f7   :  { %v278_v30 = vpop.f32.mrb[0].mxu1 }
 0x1f8   :  { %v279_v31 = vadd.f32 %v321_v28, %v278_v30  ;;  %v386_v32 = vpop.f32.mrb[1].mxu1 }
 0x1f9   :  { %v281_v34 = vpop.f32.mrb[2].mxu1 }
 0x1fa   :  { %v287_v35 = vadd.f32 %v285_v29, %v279_v31  ;;  %v282_v36 = vadd.f32 %v321_v28, %v281_v34  ;;  %v387_v37 = vpop.f32.mrb[3].mxu1 }
 0x1fc   :  { %v289_v38 = vmax.f32 %v287_v35, 0.0  ;;  %v288_v39 = vadd.f32 %v286_v33, %v282_v36 }
 0x1fe   :  { %291 = vst [vmem:[#allocation7] sm:$0xff] %v289_v38  ;;  %v290_v40 = vmax.f32 %v288_v39, 0.0 }
 0x200   :  { %292 = vst [vmem:[#allocation7 + $0x8] sm:$0xff] %v290_v40 }
 0x201   :  { %470 = shalt.err (!%p467_p6)
}
 0x202   :  { %s471_s25 = scalar_lea.hbm %s576_s5, 256 }
 0x203   :  { %p472_p7 = scmp.ne.s32.totalorder %s576_s5, %s471_s25  ;;  %p475_p8 = scmp.lt.u32.totalorder %s471_s25, %s576_s5 }
 0x205   :  { %p477_p9 = pnand %p475_p8, %p472_p7 }
 0x207   :  { %480 = shalt.err (!%p477_p9)
}
 0x208   :  { %s494_s30 = smov 128   ;;  %s495_s6 = smov 8  }
 0x209   :  { %304 = dma.vmem_to_hbm [thread:$0]  %s299_s22, 256, %s576_s5, [#allocation4], %s494_s30, %s494_s30, %s495_s6  }
 0x20a   :  { %485 = dma.done.wait [#allocation4], 256  }
 0x20b   :  { %486 = vsyncadd [#allocation4], 4294967040 }
 0x20c   :  { %308 = vsyncpa [#allocation3], 1 }
 0x20d   :  { %309 = vsyncpa [#allocation6], 1 }
 0x20e   :  { %310 = vsyncpa [#allocation4], 1 }

</bundles_post_ra>
